<compile_context>
chip_gen: v5e
topology: v5e:2x2
jax: 0.10.0
libtpu: 0.0.40
codegen_flags: <defaults>
</compile_context>

<pallas_src>
import numpy as np
import jax
import jax.numpy as jnp
from jax.experimental import pallas as pl
from jax.experimental.pallas import tpu as pltpu

_EPS = 1e-7
_LANE = 128
_TILE_R_MAX = 256          # 256 * 128 = 32768 anchors per grid step (safe on v5e VMEM)

# Plane layout inside the single packed input tensor (B, 19, R, 128):
#   0..7   : pred x1,y1,x2,y2,x3,y3,x4,y4   (normalized)
#   8..15  : gt   x1,y1,x2,y2,x3,y3,x4,y4   (normalized)
#   16     : pred angle (rad)
#   17     : gt angle   (rad)
#   18     : valid mask (0/1)
_N_PLANES = 19


def _obb_loss_kernel(img_ref,      # SMEM (2B,) int32: [W0, H0, W1, H1, ...]
                     packed_ref,   # VMEM (1, 19, TILE_R, 128)
                     out_ref):     # VMEM (1, 1, 2, 128) f32: [loss-sum row, count row]
    b = pl.program_id(0)

    # Per-image scalars, factored once per grid step.
    W = img_ref[2 * b].astype(jnp.float32)
    H = img_ref[2 * b + 1].astype(jnp.float32)
    qW = W * 0.25
    qH = H * 0.25
    W2 = W * W
    H2 = H * H

    def plane(i):
        return packed_ref[0, i].astype(jnp.float32)     # (TILE_R, 128)

    def box_params(base, ang_idx):
        x1, y1 = plane(base + 0), plane(base + 1)
        x2, y2 = plane(base + 2), plane(base + 3)
        x3, y3 = plane(base + 4), plane(base + 5)
        x4, y4 = plane(base + 6), plane(base + 7)
        # Factored W/H scaling: scale sums / squared differences, not planes.
        cx = (x1 + x2 + x3 + x4) * qW
        cy = (y1 + y2 + y3 + y4) * qH
        dx21 = x2 - x1
        dy21 = y2 - y1
        dx32 = x3 - x2
        dy32 = y3 - y2
        # w, h only ever enter squared -> no sqrt needed.
        wsq = W2 * dx21 * dx21 + H2 * dy21 * dy21
        hsq = W2 * dx32 * dx32 + H2 * dy32 * dy32
        a = wsq * (1.0 / 12.0)
        bb = hsq * (1.0 / 12.0)
        r = plane(ang_idx)
        # Half-angle identity: a*c^2 + b*s^2 = (a+b)/2 + (a-b)/2*cos(2r), etc.
        cos2r = jnp.cos(2.0 * r)
        sin2r = jnp.sin(2.0 * r)
        half_sum = (a + bb) * 0.5
        half_dif = (a - bb) * 0.5
        return (cx, cy,
                half_sum + half_dif * cos2r,    # cov_xx
                half_sum - half_dif * cos2r,    # cov_yy
                half_dif * sin2r)               # cov_xy

    cx1, cy1, a1, b1, c1 = box_params(0, 16)
    cx2, cy2, a2, b2, c2 = box_params(8, 17)
    mask = plane(18)                                     # (TILE_R, 128) 0/1

    sa = a1 + a2
    sb = b1 + b2
    sc = c1 + c2
    dx = cx1 - cx2
    dy = cy1 - cy2

    denom = sa * sb - sc * sc
    inv_denom = pl.reciprocal(denom + _EPS, approx=True)
    t1 = (sa * dy * dy + sb * dx * dx) * inv_denom * 0.25
    t2 = (sc * (-dx) * dy) * inv_denom * 0.5
    det1 = jnp.maximum(a1 * b1 - c1 * c1, 0.0)
    det2 = jnp.maximum(a2 * b2 - c2 * c2, 0.0)
    t3 = 0.5 * jnp.log(denom / (4.0 * jnp.sqrt(det1 * det2) + _EPS) + _EPS)

    bd = jnp.clip(t1 + t2 + t3, _EPS, 100.0)
    hd = jnp.sqrt(1.0 - jnp.exp(-bd) + _EPS)    # per-anchor loss = 1 - iou = hd

    # Per-(b, n_tile) partial sums: two sliced row stores (no concat, no RMW).
    out_ref[0, 0, 0:1, :] = jnp.sum(hd * mask, axis=0, keepdims=True)   # loss sum
    out_ref[0, 0, 1:2, :] = jnp.sum(mask, axis=0, keepdims=True)        # count


def obb_loss(pred_obbs, gt_obbs, angles_pred, gt_angles, image_size,
             valid_mask=None, tile_r_max=_TILE_R_MAX):
    """Pallas implementation of OBBLoss.forward. Returns a scalar f32."""
    B, N, _ = pred_obbs.shape
    dtype = pred_obbs.dtype
    if valid_mask is None:
        valid_mask = jnp.ones((B, N), dtype=bool)

    # Pad N up to a lane-aligned (and, if tiled, tile-aligned) size.
    r0 = max(1, -(-N // _LANE))
    if r0 <= tile_r_max:
        tile_r = r0                              # full-extent block (always legal)
        r_tot = r0
    else:
        tile_r = tile_r_max                      # multiple of 8 -> legal block
        r_tot = -(-r0 // tile_r) * tile_r
    n_pad = r_tot * _LANE
    n_tiles = r_tot // tile_r

    # TODO(synk): ideally the producer emits this planar layout directly; the
    # transpose/pad/concat below is wrapper-side HBM traffic.
    planes = jnp.concatenate(
        [pred_obbs.astype(dtype),
         gt_obbs.astype(dtype),
         angles_pred.reshape(B, N, 1).astype(dtype),
         gt_angles.reshape(B, N, 1).astype(dtype),
         valid_mask.reshape(B, N, 1).astype(dtype)],
        axis=-1)                                          # (B, N, 19)
    planes = jnp.transpose(planes, (0, 2, 1))             # (B, 19, N)
    planes = jnp.pad(planes, ((0, 0), (0, 0), (0, n_pad - N)))
    packed = planes.reshape(B, _N_PLANES, r_tot, _LANE)   # (B, 19, R, 128)

    img = jnp.asarray(image_size, dtype=jnp.int32).reshape(-1)   # (2B,)

    grid_spec = pltpu.PrefetchScalarGridSpec(
        num_scalar_prefetch=1,
        grid=(B, n_tiles),
        in_specs=[
            pl.BlockSpec((1, _N_PLANES, tile_r, _LANE),
                         lambda b, n, img: (b, 0, n, 0)),
        ],
        # Per-(b, n_tile) partial sums -> both grid axes can be "parallel".
        out_specs=pl.BlockSpec((1, 1, 2, _LANE),
                               lambda b, n, img: (b, n, 0, 0)),
    )

    out = pl.pallas_call(
        _obb_loss_kernel,
        grid_spec=grid_spec,
        out_shape=jax.ShapeDtypeStruct((B, n_tiles, 2, _LANE), jnp.float32),
        compiler_params=pltpu.CompilerParams(
            dimension_semantics=("parallel", "parallel")),
    )(img, packed)

    # Tiny final reduction in JAX (a few floats per batch).
    loss_sum = jnp.sum(out[:, :, 0, :], axis=(1, 2))     # (B,)
    cnt = jnp.sum(out[:, :, 1, :], axis=(1, 2))          # (B,)
    has = cnt > 0.5
    per_batch = jnp.where(has, loss_sum / jnp.maximum(cnt, 1.0), 0.0)
    n_valid = jnp.sum(has.astype(jnp.float32))
    # Empty batches are skipped from the final mean (matches the PyTorch loop).
    return jnp.where(n_valid > 0,
                     jnp.sum(per_batch) / jnp.maximum(n_valid, 1.0),
                     jnp.float32(0.0))


def _ref_loss(pred, gt, angp, angg, image_size, valid_mask):
    """Pure numpy reference (mirrors the PyTorch semantics)."""
    pred = np.asarray(pred, np.float64)
    gt = np.asarray(gt, np.float64)
    angp = np.asarray(angp, np.float64)[..., 0]
    angg = np.asarray(angg, np.float64)[..., 0]
    vm = np.asarray(valid_mask)
    eps = 1e-7
    B, N, _ = pred.shape
    losses = []
    for b in range(B):
        W, H = image_size[b]

        def conv(v, a):
            x = v[:, 0::2] * W
            y = v[:, 1::2] * H
            cx = x.mean(-1)
            cy = y.mean(-1)
            w = np.sqrt((x[:, 1] - x[:, 0]) ** 2 + (y[:, 1] - y[:, 0]) ** 2)
            h = np.sqrt((x[:, 2] - x[:, 1]) ** 2 + (y[:, 2] - y[:, 1]) ** 2)
            return np.stack([cx, cy, w, h, a], -1)

        p = conv(pred[b], angp[b])[vm[b]]
        g = conv(gt[b], angg[b])[vm[b]]
        if p.shape[0] == 0:
            continue

        def cov(bx):
            a = bx[:, 2] ** 2 / 12.0
            bb = bx[:, 3] ** 2 / 12.0
            r = bx[:, 4]
            c, s = np.cos(r), np.sin(r)
            return a * c * c + bb * s * s, a * s * s + bb * c * c, (a - bb) * c * s

        a1, b1, c1 = cov(p)
        a2, b2, c2 = cov(g)
        x1, y1 = p[:, 0], p[:, 1]
        x2, y2 = g[:, 0], g[:, 1]
        denom = (a1 + a2) * (b1 + b2) - (c1 + c2) ** 2
        t1 = ((a1 + a2) * (y1 - y2) ** 2 + (b1 + b2) * (x1 - x2) ** 2) / (denom + eps) * 0.25
        t2 = ((c1 + c2) * (x2 - x1) * (y1 - y2)) / (denom + eps) * 0.5
        t3 = 0.5 * np.log(denom / (4.0 * np.sqrt(np.clip(a1 * b1 - c1 ** 2, 0, None)
                                                 * np.clip(a2 * b2 - c2 ** 2, 0, None)) + eps) + eps)
        bd = np.clip(t1 + t2 + t3, eps, 100.0)
        hd = np.sqrt(1.0 - np.exp(-bd) + eps)
        iou = 1.0 - hd
        losses.append(float((1.0 - iou).mean()))
    if not losses:
        return 0.0
    return float(np.mean(losses))


if __name__ == "__main__":
    key = jax.random.PRNGKey(0)
    image_size = [(640, 480), (320, 256)]
    # (B, N, tile_r_max) — third case forces the multi-tile (n_tiles > 1) path
    # with a small tile so both grid axes are exercised at small shapes.
    cases = [(2, 8, _TILE_R_MAX), (2, 200, _TILE_R_MAX), (2, 1152, 8)]
    for (B, N, tr_max) in cases:
        ks = jax.random.split(jax.random.fold_in(key, N), 5)
        pred_obbs = jax.random.uniform(ks[0], (B, N, 8), jnp.float32)
        gt_obbs = jax.random.uniform(ks[1], (B, N, 8), jnp.float32)
        angles_pred = jax.random.uniform(ks[2], (B, N, 1), jnp.float32,
                                         minval=-jnp.pi / 2, maxval=jnp.pi / 2)
        gt_angles = jax.random.uniform(ks[3], (B, N, 1), jnp.float32,
                                       minval=-jnp.pi / 2, maxval=jnp.pi / 2)
        valid_mask = jax.random.uniform(ks[4], (B, N)) > 0.3

        loss = obb_loss(pred_obbs, gt_obbs, angles_pred, gt_angles,
                        image_size[:B], valid_mask, tile_r_max=tr_max)
        loss = jax.block_until_ready(loss)

        ref = _ref_loss(pred_obbs, gt_obbs, angles_pred, gt_angles,
                        image_size[:B], valid_mask)
        assert np.isfinite(float(loss)), "loss is not finite"
        assert abs(float(loss) - ref) < 1e-3, (B, N, float(loss), ref)
    print("KERNEL_OK")
</pallas_src>

<mosaic_0001>
module attributes {stable_mosaic.version = 11 : i64} {
  func.func @_obb_loss_kernel(%arg0: i32, %arg1: i32, %arg2: memref<4xi32, #tpu.memory_space<smem>>, %arg3: memref<1x19x1x128xf32, #tpu.memory_space<vmem>>, %arg4: memref<1x1x2x128xf32, #tpu.memory_space<vmem>>) attributes {dimension_semantics = [#tpu.dimension_semantics<parallel>, #tpu.dimension_semantics<parallel>], iteration_bounds = array<i64: 2, 1>, scalar_prefetch = 1 : i64, scratch_operands = 0 : i64, tpu.core_type = #tpu.core_type<tc>, window_params = [{transform_indices = @transform_0, window_bounds = array<i64: 1, 19, 1, 128>}, {transform_indices = @transform_1, window_bounds = array<i64: 1, 1, 2, 128>}]} {
    %c2_i32 = arith.constant 2 : i32
    %0 = arith.muli %c2_i32, %arg0 : i32
    %1 = arith.index_cast %0 : i32 to index
    %2 = memref.load %arg2[%1] : memref<4xi32, #tpu.memory_space<smem>>
    %3 = arith.sitofp %2 : i32 to f32
    %c2_i32_0 = arith.constant 2 : i32
    %4 = arith.muli %c2_i32_0, %arg0 : i32
    %c1_i32 = arith.constant 1 : i32
    %5 = arith.addi %4, %c1_i32 : i32
    %6 = arith.index_cast %5 : i32 to index
    %7 = memref.load %arg2[%6] : memref<4xi32, #tpu.memory_space<smem>>
    %8 = arith.sitofp %7 : i32 to f32
    %cst = arith.constant 2.500000e-01 : f32
    %9 = arith.mulf %3, %cst : f32
    %cst_1 = arith.constant 2.500000e-01 : f32
    %10 = arith.mulf %8, %cst_1 : f32
    %11 = arith.mulf %3, %3 : f32
    %12 = arith.mulf %8, %8 : f32
    %c0 = arith.constant 0 : index
    %c0_2 = arith.constant 0 : index
    %c0_3 = arith.constant 0 : index
    %c0_4 = arith.constant 0 : index
    %13 = vector.load %arg3[%c0, %c0_2, %c0_3, %c0_4] : memref<1x19x1x128xf32, #tpu.memory_space<vmem>>, vector<1x1x1x128xf32>
    %14 = vector.shape_cast %13 : vector<1x1x1x128xf32> to vector<1x128xf32>
    %c0_5 = arith.constant 0 : index
    %c1 = arith.constant 1 : index
    %c0_6 = arith.constant 0 : index
    %c0_7 = arith.constant 0 : index
    %15 = vector.load %arg3[%c0_5, %c1, %c0_6, %c0_7] : memref<1x19x1x128xf32, #tpu.memory_space<vmem>>, vector<1x1x1x128xf32>
    %16 = vector.shape_cast %15 : vector<1x1x1x128xf32> to vector<1x128xf32>
    %c0_8 = arith.constant 0 : index
    %c2 = arith.constant 2 : index
    %c0_9 = arith.constant 0 : index
    %c0_10 = arith.constant 0 : index
    %17 = vector.load %arg3[%c0_8, %c2, %c0_9, %c0_10] : memref<1x19x1x128xf32, #tpu.memory_space<vmem>>, vector<1x1x1x128xf32>
    %18 = vector.shape_cast %17 : vector<1x1x1x128xf32> to vector<1x128xf32>
    %c0_11 = arith.constant 0 : index
    %c3 = arith.constant 3 : index
    %c0_12 = arith.constant 0 : index
    %c0_13 = arith.constant 0 : index
    %19 = vector.load %arg3[%c0_11, %c3, %c0_12, %c0_13] : memref<1x19x1x128xf32, #tpu.memory_space<vmem>>, vector<1x1x1x128xf32>
    %20 = vector.shape_cast %19 : vector<1x1x1x128xf32> to vector<1x128xf32>
    %c0_14 = arith.constant 0 : index
    %c4 = arith.constant 4 : index
    %c0_15 = arith.constant 0 : index
    %c0_16 = arith.constant 0 : index
    %21 = vector.load %arg3[%c0_14, %c4, %c0_15, %c0_16] : memref<1x19x1x128xf32, #tpu.memory_space<vmem>>, vector<1x1x1x128xf32>
    %22 = vector.shape_cast %21 : vector<1x1x1x128xf32> to vector<1x128xf32>
    %c0_17 = arith.constant 0 : index
    %c5 = arith.constant 5 : index
    %c0_18 = arith.constant 0 : index
    %c0_19 = arith.constant 0 : index
    %23 = vector.load %arg3[%c0_17, %c5, %c0_18, %c0_19] : memref<1x19x1x128xf32, #tpu.memory_space<vmem>>, vector<1x1x1x128xf32>
    %24 = vector.shape_cast %23 : vector<1x1x1x128xf32> to vector<1x128xf32>
    %c0_20 = arith.constant 0 : index
    %c6 = arith.constant 6 : index
    %c0_21 = arith.constant 0 : index
    %c0_22 = arith.constant 0 : index
    %25 = vector.load %arg3[%c0_20, %c6, %c0_21, %c0_22] : memref<1x19x1x128xf32, #tpu.memory_space<vmem>>, vector<1x1x1x128xf32>
    %26 = vector.shape_cast %25 : vector<1x1x1x128xf32> to vector<1x128xf32>
    %c0_23 = arith.constant 0 : index
    %c7 = arith.constant 7 : index
    %c0_24 = arith.constant 0 : index
    %c0_25 = arith.constant 0 : index
    %27 = vector.load %arg3[%c0_23, %c7, %c0_24, %c0_25] : memref<1x19x1x128xf32, #tpu.memory_space<vmem>>, vector<1x1x1x128xf32>
    %28 = vector.shape_cast %27 : vector<1x1x1x128xf32> to vector<1x128xf32>
    %29 = arith.addf %14, %18 : vector<1x128xf32>
    %30 = arith.addf %29, %22 : vector<1x128xf32>
    %31 = arith.addf %30, %26 : vector<1x128xf32>
    %32 = vector.broadcast %9 : f32 to vector<1x128xf32>
    %33 = arith.mulf %31, %32 : vector<1x128xf32>
    %34 = arith.addf %16, %20 : vector<1x128xf32>
    %35 = arith.addf %34, %24 : vector<1x128xf32>
    %36 = arith.addf %35, %28 : vector<1x128xf32>
    %37 = vector.broadcast %10 : f32 to vector<1x128xf32>
    %38 = arith.mulf %36, %37 : vector<1x128xf32>
    %39 = arith.subf %18, %14 : vector<1x128xf32>
    %40 = arith.subf %20, %16 : vector<1x128xf32>
    %41 = arith.subf %22, %18 : vector<1x128xf32>
    %42 = arith.subf %24, %20 : vector<1x128xf32>
    %43 = vector.broadcast %11 : f32 to vector<1x128xf32>
    %44 = arith.mulf %43, %39 : vector<1x128xf32>
    %45 = arith.mulf %44, %39 : vector<1x128xf32>
    %46 = vector.broadcast %12 : f32 to vector<1x128xf32>
    %47 = arith.mulf %46, %40 : vector<1x128xf32>
    %48 = arith.mulf %47, %40 : vector<1x128xf32>
    %49 = arith.addf %45, %48 : vector<1x128xf32>
    %50 = vector.broadcast %11 : f32 to vector<1x128xf32>
    %51 = arith.mulf %50, %41 : vector<1x128xf32>
    %52 = arith.mulf %51, %41 : vector<1x128xf32>
    %53 = vector.broadcast %12 : f32 to vector<1x128xf32>
    %54 = arith.mulf %53, %42 : vector<1x128xf32>
    %55 = arith.mulf %54, %42 : vector<1x128xf32>
    %56 = arith.addf %52, %55 : vector<1x128xf32>
    %cst_26 = arith.constant 0.0833333358 : f32
    %57 = vector.broadcast %cst_26 : f32 to vector<1x128xf32>
    %58 = arith.mulf %49, %57 : vector<1x128xf32>
    %cst_27 = arith.constant 0.0833333358 : f32
    %59 = vector.broadcast %cst_27 : f32 to vector<1x128xf32>
    %60 = arith.mulf %56, %59 : vector<1x128xf32>
    %c0_28 = arith.constant 0 : index
    %c16 = arith.constant 16 : index
    %c0_29 = arith.constant 0 : index
    %c0_30 = arith.constant 0 : index
    %61 = vector.load %arg3[%c0_28, %c16, %c0_29, %c0_30] : memref<1x19x1x128xf32, #tpu.memory_space<vmem>>, vector<1x1x1x128xf32>
    %62 = vector.shape_cast %61 : vector<1x1x1x128xf32> to vector<1x128xf32>
    %cst_31 = arith.constant 2.000000e+00 : f32
    %63 = vector.broadcast %cst_31 : f32 to vector<1x128xf32>
    %64 = arith.mulf %63, %62 : vector<1x128xf32>
    %65 = math.cos %64 : vector<1x128xf32>
    %cst_32 = arith.constant 2.000000e+00 : f32
    %66 = vector.broadcast %cst_32 : f32 to vector<1x128xf32>
    %67 = arith.mulf %66, %62 : vector<1x128xf32>
    %68 = math.sin %67 : vector<1x128xf32>
    %69 = arith.addf %58, %60 : vector<1x128xf32>
    %cst_33 = arith.constant 5.000000e-01 : f32
    %70 = vector.broadcast %cst_33 : f32 to vector<1x128xf32>
    %71 = arith.mulf %69, %70 : vector<1x128xf32>
    %72 = arith.subf %58, %60 : vector<1x128xf32>
    %cst_34 = arith.constant 5.000000e-01 : f32
    %73 = vector.broadcast %cst_34 : f32 to vector<1x128xf32>
    %74 = arith.mulf %72, %73 : vector<1x128xf32>
    %75 = arith.mulf %74, %65 : vector<1x128xf32>
    %76 = arith.addf %71, %75 : vector<1x128xf32>
    %77 = arith.mulf %74, %65 : vector<1x128xf32>
    %78 = arith.subf %71, %77 : vector<1x128xf32>
    %79 = arith.mulf %74, %68 : vector<1x128xf32>
    %c0_35 = arith.constant 0 : index
    %c8 = arith.constant 8 : index
    %c0_36 = arith.constant 0 : index
    %c0_37 = arith.constant 0 : index
    %80 = vector.load %arg3[%c0_35, %c8, %c0_36, %c0_37] : memref<1x19x1x128xf32, #tpu.memory_space<vmem>>, vector<1x1x1x128xf32>
    %81 = vector.shape_cast %80 : vector<1x1x1x128xf32> to vector<1x128xf32>
    %c0_38 = arith.constant 0 : index
    %c9 = arith.constant 9 : index
    %c0_39 = arith.constant 0 : index
    %c0_40 = arith.constant 0 : index
    %82 = vector.load %arg3[%c0_38, %c9, %c0_39, %c0_40] : memref<1x19x1x128xf32, #tpu.memory_space<vmem>>, vector<1x1x1x128xf32>
    %83 = vector.shape_cast %82 : vector<1x1x1x128xf32> to vector<1x128xf32>
    %c0_41 = arith.constant 0 : index
    %c10 = arith.constant 10 : index
    %c0_42 = arith.constant 0 : index
    %c0_43 = arith.constant 0 : index
    %84 = vector.load %arg3[%c0_41, %c10, %c0_42, %c0_43] : memref<1x19x1x128xf32, #tpu.memory_space<vmem>>, vector<1x1x1x128xf32>
    %85 = vector.shape_cast %84 : vector<1x1x1x128xf32> to vector<1x128xf32>
    %c0_44 = arith.constant 0 : index
    %c11 = arith.constant 11 : index
    %c0_45 = arith.constant 0 : index
    %c0_46 = arith.constant 0 : index
    %86 = vector.load %arg3[%c0_44, %c11, %c0_45, %c0_46] : memref<1x19x1x128xf32, #tpu.memory_space<vmem>>, vector<1x1x1x128xf32>
    %87 = vector.shape_cast %86 : vector<1x1x1x128xf32> to vector<1x128xf32>
    %c0_47 = arith.constant 0 : index
    %c12 = arith.constant 12 : index
    %c0_48 = arith.constant 0 : index
    %c0_49 = arith.constant 0 : index
    %88 = vector.load %arg3[%c0_47, %c12, %c0_48, %c0_49] : memref<1x19x1x128xf32, #tpu.memory_space<vmem>>, vector<1x1x1x128xf32>
    %89 = vector.shape_cast %88 : vector<1x1x1x128xf32> to vector<1x128xf32>
    %c0_50 = arith.constant 0 : index
    %c13 = arith.constant 13 : index
    %c0_51 = arith.constant 0 : index
    %c0_52 = arith.constant 0 : index
    %90 = vector.load %arg3[%c0_50, %c13, %c0_51, %c0_52] : memref<1x19x1x128xf32, #tpu.memory_space<vmem>>, vector<1x1x1x128xf32>
    %91 = vector.shape_cast %90 : vector<1x1x1x128xf32> to vector<1x128xf32>
    %c0_53 = arith.constant 0 : index
    %c14 = arith.constant 14 : index
    %c0_54 = arith.constant 0 : index
    %c0_55 = arith.constant 0 : index
    %92 = vector.load %arg3[%c0_53, %c14, %c0_54, %c0_55] : memref<1x19x1x128xf32, #tpu.memory_space<vmem>>, vector<1x1x1x128xf32>
    %93 = vector.shape_cast %92 : vector<1x1x1x128xf32> to vector<1x128xf32>
    %c0_56 = arith.constant 0 : index
    %c15 = arith.constant 15 : index
    %c0_57 = arith.constant 0 : index
    %c0_58 = arith.constant 0 : index
    %94 = vector.load %arg3[%c0_56, %c15, %c0_57, %c0_58] : memref<1x19x1x128xf32, #tpu.memory_space<vmem>>, vector<1x1x1x128xf32>
    %95 = vector.shape_cast %94 : vector<1x1x1x128xf32> to vector<1x128xf32>
    %96 = arith.addf %81, %85 : vector<1x128xf32>
    %97 = arith.addf %96, %89 : vector<1x128xf32>
    %98 = arith.addf %97, %93 : vector<1x128xf32>
    %99 = vector.broadcast %9 : f32 to vector<1x128xf32>
    %100 = arith.mulf %98, %99 : vector<1x128xf32>
    %101 = arith.addf %83, %87 : vector<1x128xf32>
    %102 = arith.addf %101, %91 : vector<1x128xf32>
    %103 = arith.addf %102, %95 : vector<1x128xf32>
    %104 = vector.broadcast %10 : f32 to vector<1x128xf32>
    %105 = arith.mulf %103, %104 : vector<1x128xf32>
    %106 = arith.subf %85, %81 : vector<1x128xf32>
    %107 = arith.subf %87, %83 : vector<1x128xf32>
    %108 = arith.subf %89, %85 : vector<1x128xf32>
    %109 = arith.subf %91, %87 : vector<1x128xf32>
    %110 = vector.broadcast %11 : f32 to vector<1x128xf32>
    %111 = arith.mulf %110, %106 : vector<1x128xf32>
    %112 = arith.mulf %111, %106 : vector<1x128xf32>
    %113 = vector.broadcast %12 : f32 to vector<1x128xf32>
    %114 = arith.mulf %113, %107 : vector<1x128xf32>
    %115 = arith.mulf %114, %107 : vector<1x128xf32>
    %116 = arith.addf %112, %115 : vector<1x128xf32>
    %117 = vector.broadcast %11 : f32 to vector<1x128xf32>
    %118 = arith.mulf %117, %108 : vector<1x128xf32>
    %119 = arith.mulf %118, %108 : vector<1x128xf32>
    %120 = vector.broadcast %12 : f32 to vector<1x128xf32>
    %121 = arith.mulf %120, %109 : vector<1x128xf32>
    %122 = arith.mulf %121, %109 : vector<1x128xf32>
    %123 = arith.addf %119, %122 : vector<1x128xf32>
    %cst_59 = arith.constant 0.0833333358 : f32
    %124 = vector.broadcast %cst_59 : f32 to vector<1x128xf32>
    %125 = arith.mulf %116, %124 : vector<1x128xf32>
    %cst_60 = arith.constant 0.0833333358 : f32
    %126 = vector.broadcast %cst_60 : f32 to vector<1x128xf32>
    %127 = arith.mulf %123, %126 : vector<1x128xf32>
    %c0_61 = arith.constant 0 : index
    %c17 = arith.constant 17 : index
    %c0_62 = arith.constant 0 : index
    %c0_63 = arith.constant 0 : index
    %128 = vector.load %arg3[%c0_61, %c17, %c0_62, %c0_63] : memref<1x19x1x128xf32, #tpu.memory_space<vmem>>, vector<1x1x1x128xf32>
    %129 = vector.shape_cast %128 : vector<1x1x1x128xf32> to vector<1x128xf32>
    %cst_64 = arith.constant 2.000000e+00 : f32
    %130 = vector.broadcast %cst_64 : f32 to vector<1x128xf32>
    %131 = arith.mulf %130, %129 : vector<1x128xf32>
    %132 = math.cos %131 : vector<1x128xf32>
    %cst_65 = arith.constant 2.000000e+00 : f32
    %133 = vector.broadcast %cst_65 : f32 to vector<1x128xf32>
    %134 = arith.mulf %133, %129 : vector<1x128xf32>
    %135 = math.sin %134 : vector<1x128xf32>
    %136 = arith.addf %125, %127 : vector<1x128xf32>
    %cst_66 = arith.constant 5.000000e-01 : f32
    %137 = vector.broadcast %cst_66 : f32 to vector<1x128xf32>
    %138 = arith.mulf %136, %137 : vector<1x128xf32>
    %139 = arith.subf %125, %127 : vector<1x128xf32>
    %cst_67 = arith.constant 5.000000e-01 : f32
    %140 = vector.broadcast %cst_67 : f32 to vector<1x128xf32>
    %141 = arith.mulf %139, %140 : vector<1x128xf32>
    %142 = arith.mulf %141, %132 : vector<1x128xf32>
    %143 = arith.addf %138, %142 : vector<1x128xf32>
    %144 = arith.mulf %141, %132 : vector<1x128xf32>
    %145 = arith.subf %138, %144 : vector<1x128xf32>
    %146 = arith.mulf %141, %135 : vector<1x128xf32>
    %c0_68 = arith.constant 0 : index
    %c18 = arith.constant 18 : index
    %c0_69 = arith.constant 0 : index
    %c0_70 = arith.constant 0 : index
    %147 = vector.load %arg3[%c0_68, %c18, %c0_69, %c0_70] : memref<1x19x1x128xf32, #tpu.memory_space<vmem>>, vector<1x1x1x128xf32>
    %148 = vector.shape_cast %147 : vector<1x1x1x128xf32> to vector<1x128xf32>
    %149 = arith.addf %76, %143 : vector<1x128xf32>
    %150 = arith.addf %78, %145 : vector<1x128xf32>
    %151 = arith.addf %79, %146 : vector<1x128xf32>
    %152 = arith.subf %33, %100 : vector<1x128xf32>
    %153 = arith.subf %38, %105 : vector<1x128xf32>
    %154 = arith.mulf %149, %150 : vector<1x128xf32>
    %155 = arith.mulf %151, %151 : vector<1x128xf32>
    %156 = arith.subf %154, %155 : vector<1x128xf32>
    %cst_71 = arith.constant 1.000000e-07 : f32
    %157 = vector.broadcast %cst_71 : f32 to vector<1x128xf32>
    %158 = arith.addf %156, %157 : vector<1x128xf32>
    %159 = tpu.reciprocal %158 {approx = true} : vector<1x128xf32> -> vector<1x128xf32>
    %160 = arith.mulf %149, %153 : vector<1x128xf32>
    %161 = arith.mulf %160, %153 : vector<1x128xf32>
    %162 = arith.mulf %150, %152 : vector<1x128xf32>
    %163 = arith.mulf %162, %152 : vector<1x128xf32>
    %164 = arith.addf %161, %163 : vector<1x128xf32>
    %165 = arith.mulf %164, %159 : vector<1x128xf32>
    %cst_72 = arith.constant 2.500000e-01 : f32
    %166 = vector.broadcast %cst_72 : f32 to vector<1x128xf32>
    %167 = arith.mulf %165, %166 : vector<1x128xf32>
    %cst_73 = arith.constant 0.000000e+00 : f32
    %168 = vector.broadcast %cst_73 : f32 to vector<1x128xf32>
    %169 = arith.subf %168, %152 : vector<1x128xf32>
    %170 = arith.mulf %151, %169 : vector<1x128xf32>
    %171 = arith.mulf %170, %153 : vector<1x128xf32>
    %172 = arith.mulf %171, %159 : vector<1x128xf32>
    %cst_74 = arith.constant 5.000000e-01 : f32
    %173 = vector.broadcast %cst_74 : f32 to vector<1x128xf32>
    %174 = arith.mulf %172, %173 : vector<1x128xf32>
    %175 = arith.mulf %76, %78 : vector<1x128xf32>
    %176 = arith.mulf %79, %79 : vector<1x128xf32>
    %177 = arith.subf %175, %176 : vector<1x128xf32>
    %cst_75 = arith.constant 0.000000e+00 : f32
    %178 = vector.broadcast %cst_75 : f32 to vector<1x128xf32>
    %179 = arith.maximumf %177, %178 : vector<1x128xf32>
    %180 = arith.mulf %143, %145 : vector<1x128xf32>
    %181 = arith.mulf %146, %146 : vector<1x128xf32>
    %182 = arith.subf %180, %181 : vector<1x128xf32>
    %cst_76 = arith.constant 0.000000e+00 : f32
    %183 = vector.broadcast %cst_76 : f32 to vector<1x128xf32>
    %184 = arith.maximumf %182, %183 : vector<1x128xf32>
    %185 = arith.mulf %179, %184 : vector<1x128xf32>
    %186 = math.sqrt %185 : vector<1x128xf32>
    %cst_77 = arith.constant 4.000000e+00 : f32
    %187 = vector.broadcast %cst_77 : f32 to vector<1x128xf32>
    %188 = arith.mulf %187, %186 : vector<1x128xf32>
    %cst_78 = arith.constant 1.000000e-07 : f32
    %189 = vector.broadcast %cst_78 : f32 to vector<1x128xf32>
    %190 = arith.addf %188, %189 : vector<1x128xf32>
    %191 = arith.divf %156, %190 : vector<1x128xf32>
    %cst_79 = arith.constant 1.000000e-07 : f32
    %192 = vector.broadcast %cst_79 : f32 to vector<1x128xf32>
    %193 = arith.addf %191, %192 : vector<1x128xf32>
    %194 = math.log %193 : vector<1x128xf32>
    %cst_80 = arith.constant 5.000000e-01 : f32
    %195 = vector.broadcast %cst_80 : f32 to vector<1x128xf32>
    %196 = arith.mulf %195, %194 : vector<1x128xf32>
    %197 = arith.addf %167, %174 : vector<1x128xf32>
    %198 = arith.addf %197, %196 : vector<1x128xf32>
    %cst_81 = arith.constant 1.000000e-07 : f32
    %cst_82 = arith.constant 1.000000e+02 : f32
    %199 = vector.broadcast %cst_81 : f32 to vector<1x128xf32>
    %200 = arith.maximumf %199, %198 : vector<1x128xf32>
    %201 = vector.broadcast %cst_82 : f32 to vector<1x128xf32>
    %202 = arith.minimumf %201, %200 : vector<1x128xf32>
    %cst_83 = arith.constant 0.000000e+00 : f32
    %203 = vector.broadcast %cst_83 : f32 to vector<1x128xf32>
    %204 = arith.subf %203, %202 : vector<1x128xf32>
    %205 = math.exp %204 : vector<1x128xf32>
    %cst_84 = arith.constant 1.000000e+00 : f32
    %206 = vector.broadcast %cst_84 : f32 to vector<1x128xf32>
    %207 = arith.subf %206, %205 : vector<1x128xf32>
    %cst_85 = arith.constant 1.000000e-07 : f32
    %208 = vector.broadcast %cst_85 : f32 to vector<1x128xf32>
    %209 = arith.addf %207, %208 : vector<1x128xf32>
    %210 = math.sqrt %209 : vector<1x128xf32>
    %211 = arith.mulf %210, %148 : vector<1x128xf32>
    %cst_86 = arith.constant dense<0.000000e+00> : vector<128xf32>
    %212 = vector.multi_reduction <add>, %211, %cst_86 [0] : vector<1x128xf32> to vector<128xf32>
    %213 = vector.shape_cast %212 : vector<128xf32> to vector<1x128xf32>
    %c0_87 = arith.constant 0 : index
    %c0_88 = arith.constant 0 : index
    %c0_89 = arith.constant 0 : index
    %c0_90 = arith.constant 0 : index
    %214 = vector.load %arg4[%c0_87, %c0_88, %c0_89, %c0_90] : memref<1x1x2x128xf32, #tpu.memory_space<vmem>>, vector<1x1x1x128xf32>
    %215 = vector.shape_cast %214 : vector<1x1x1x128xf32> to vector<1x128xf32>
    %216 = vector.shape_cast %213 : vector<1x128xf32> to vector<1x1x1x128xf32>
    tpu.vector_store %arg4[%c0_87, %c0_88, %c0_89, %c0_90], %216 {strides = array<i32>} : memref<1x1x2x128xf32, #tpu.memory_space<vmem>>, vector<1x1x1x128xf32>,
    %cst_91 = arith.constant dense<0.000000e+00> : vector<128xf32>
    %217 = vector.multi_reduction <add>, %148, %cst_91 [0] : vector<1x128xf32> to vector<128xf32>
    %218 = vector.shape_cast %217 : vector<128xf32> to vector<1x128xf32>
    %c0_92 = arith.constant 0 : index
    %c0_93 = arith.constant 0 : index
    %c1_94 = arith.constant 1 : index
    %c0_95 = arith.constant 0 : index
    %219 = vector.load %arg4[%c0_92, %c0_93, %c1_94, %c0_95] : memref<1x1x2x128xf32, #tpu.memory_space<vmem>>, vector<1x1x1x128xf32>
    %220 = vector.shape_cast %219 : vector<1x1x1x128xf32> to vector<1x128xf32>
    %221 = vector.shape_cast %218 : vector<1x128xf32> to vector<1x1x1x128xf32>
    tpu.vector_store %arg4[%c0_92, %c0_93, %c1_94, %c0_95], %221 {strides = array<i32>} : memref<1x1x2x128xf32, #tpu.memory_space<vmem>>, vector<1x1x1x128xf32>,
    return
  }
  func.func @transform_0(%arg0: i32, %arg1: i32, %arg2: memref<4xi32, #tpu.memory_space<smem>>) -> (i32, i32, i32, i32) {
    %c0_i32 = arith.constant 0 : i32
    %c0_i32_0 = arith.constant 0 : i32
    %c0_i32_1 = arith.constant 0 : i32
    return %arg0, %c0_i32, %arg1, %c0_i32_0 : i32, i32, i32, i32
  }
  func.func @transform_1(%arg0: i32, %arg1: i32, %arg2: memref<4xi32, #tpu.memory_space<smem>>) -> (i32, i32, i32, i32) {
    %c0_i32 = arith.constant 0 : i32
    %c0_i32_0 = arith.constant 0 : i32
    %c0_i32_1 = arith.constant 0 : i32
    return %arg0, %arg1, %c0_i32, %c0_i32_0 : i32, i32, i32, i32
  }
}

</mosaic_0001>

<bundles_post_ra>
// kernel: tpu_custom_call.1
= control target key start
LH: loop header
LB: loop body
LE: loop exit
PB: predicated region body
PF: predicated region fallthrough
CT: control target
= control target key end

     0   :  { %s1340_s12 = smov [#allocation3]   ;;  %s1791_s0 = inlined_call_operand.hbm [shape: s32[4], index: 0, kind: input, shape index: {}]   ;;  %s1792_s1 = inlined_call_operand.hbm [shape: f32[2,19,1,128], index: 1, kind: input, shape index: {}]   ;;  %s1793_s2 = inlined_call_operand.hbm [shape: f32[2,1,2,128], index: 2, kind: output, shape index: {}]  }
   0x1   :  { %s8_s11 = sshll.u32 %s1791_s0, 4  ;;  %s9_s11 = int_to_ptr.hbm [resolvable:$true] %s8_s11 }
   0x2   :  { %11 = dma.hbm_to_smem %s9_s11, 16, %s1340_s12, [#allocation2] }
   0x3   :  { %1306 = dma.done.wait [#allocation2], 16 }
   0x4   :  { %1307 = vsyncadd [#allocation2], 4294967280 }
   0x5   :  { %14 = sfence }
   0x6   :  { %15 = vsyncpa [#allocation5], 0 }
   0x7   :  { %17 = vsyncpa [#allocation5 + $0x1], 0 }
   0x8   :  { %18 = vsyncpa [#allocation6], 0 }
   0x9   :  { %20 = vsyncpa [#allocation6 + $0x1], 0  ;;  %s1368_s13 = smov 0   ;;  %s1370_s14 = smov 0  }
   0xa   :  { %s1372_s15 = smov 0   ;;  %s1374_s16 = smov 0  }
   0xb   :  { %s1376_s17 = smov 0   ;;  %s1378_s0 = smov 0  }
   0xc LB: > { %s1084_s18 = sadd.s32 4294967295, %s1338_s0   ;;  %s1085_s19 = sadd.s32 4294967294, %s1338_s0   ;;  %s1338_s0 = sphi %s1378_s0, %s26_s0   ;;  %s1334_s17 = sphi %s1376_s17, %s1806_s17   ;;  %s1330_s16 = sphi %s1374_s16, %s1805_s16   ;;  %s1326_s15 = sphi %s1372_s15, %s1804_s15   ;;  %s1322_s14 = sphi %s1370_s14, %s1803_s14   ;;  %s1318_s13 = sphi %s1368_s13, %s1802_s13  }
   0xd   : > { %s38_s20 = sadd.s32 1, %s1334_s17  ;;  %s47_s21 = sadd.s32 1, %s1326_s15 }
   0xe   : > { %p40_p0 = scmp.ge.s32.totalorder %s38_s20, 2  ;;  %p54_p1 = scmp.ne.s32.totalorder %s1326_s15, %s1322_s14 }
   0xf   : > { %p55_p2 = scmp.eq.s32.totalorder %s1338_s0, 0  ;;  %p60_p3 = scmp.ne.s32.totalorder %s1322_s14, %s1318_s13 }
  0x10   : > { %s1808_s20 = smov (%p40_p0, %s38_s20), 0  ;;  %p61_p5 = scmp.eq.s32.totalorder %s1084_s18, 0 }
  0x11   : > { %p1409_p4 = por %p55_p2, %p54_p1  ;;  %s42_s23 = ssub.s32 %s1334_s17, %s1808_s20 }
  0x12   : > { %p86_p6 = scmp.eq.s32.totalorder %s1084_s18, 1  ;;  %p45_p7 = scmp.eq.s32.totalorder %s42_s23, 0 }
  0x13   : > { %p1415_p8 = por %p61_p5, %p60_p3  ;;  %p92_p10 = scmp.eq.s32.totalorder %s1085_s19, 1 }
  0x14   : > { %p1419_p9 = por %p86_p6, %p54_p1  ;;  %p1087_p12 = scmp.ge.s32.totalorder %s1338_s0, 2 }
  0x15   : > { %s1424_s26 = scalar_select %p45_p7, %s1326_s15, %s47_s21  }
  0x16   : > { %p1426_p11 = por %p92_p10, %p60_p3  ;;  %p1140_p13 = scmp.lt.s32.totalorder %s1338_s0, 2 }
  0x17   : > { %s112_s28 = sand.u32 1, %s1326_s15   ;;  %s1126_s30 = smul.u32 19, %s1334_s17 }
  0x18   : > { %s1125_s29 = smul.u32 19, %s112_s28  ;;  %p1133_p0 = pnand %p1140_p13, %p1409_p4 }
  0x19   : > { %s121_s5 = scalar_lea.hbm %s1792_s1, %s1126_s30  ;;  %p1088_p1 = scmp.ge.s32.totalorder %s1338_s0, 1 }
  0x1a   : > { %s116_s6 = scalar_lea.vmem [#allocation4], %s1125_s29  ;;  %s122_s8 = sshll.u32 %s121_s5, 4  ;;  %s123_s8 = int_to_ptr.hbm [resolvable:$true] %s122_s8 }
  0x1b   : > { %s124_s7 = sshll.u32 %s116_s6, 4  ;;  %s113_s9 = scalar_lea.sflag [#allocation5], %s112_s28  ;;  %s125_s7 = int_to_ptr.vmem [resolvable:$true] %s124_s7 }
  0x1c   : > { %s1341_s10 = smov 16   ;;  %s1342_s11 = smov 1  }
  0x1d   : > { %1135 = dma.hbm_to_vmem [thread:$0]  (!%p1133_p0), %s123_s8, 304, %s125_s7, %s113_s9, %s1341_s10, %s1341_s10, %s1342_s11  }
  0x1e   : > { %p132_p2 = scmp.lt.s32.totalorder %s1338_s0, 3 }
  0x20   : > { %p133_p3 = pnand %p1088_p1, %p132_p2 }
  0x21   : > { %s1442_s12 = sand.u32 (!%p133_p3), 1, %s1322_s14  }
  0x22   : > { %136 = sbr.rel (%p133_p3) target bundleno = 276 (0x114), region = 24  ;;  %s139_s19 = scalar_lea.sflag (!%p133_p3), [#allocation5], %s1442_s12 }
  0x23   : > { %s1127_s18 = smul.u32 (!%p133_p3), 19, %s1442_s12 }
  0x25   : > { %s1446_s21 = scalar_lea.vmem (!%p133_p3), [#allocation4], %s1127_s18 }
  0x27   : > { %1309 = dma.done.wait (%p1415_p8), %s139_s19, 304  }
  0x28   : > { %1311 = vsyncadd (%p1415_p8), %s139_s19, 4294966992  ;;  %v1098_v0 = vld [vmem:[%s1446_s21 + $0x10] sm:$0x1]  ;;  %v1113_v1 = vld [vmem:[%s1446_s21 + $0x11] sm:$0x1]  ;;  %s1599_s22 = sshll.u32 %s1330_s16, 1 }
  0x29   : > { %v1454_v2 = vmul.f32 2.0, %v1098_v0  ;;  %v1456_v3 = vmul.f32 2.0, %v1113_v1  ;;  %v1343_v25 = vmov 683565275   ;;  %v1344_v27 = vmov 2475754826   ;;  %s999_s10 = scalar_lea.hbm %s1793_s2, %s1599_s22 }
  0x2a   : > { %v1345_v29 = vmov 2131351028   ;;  %v1346_v31 = vmov 2102212464   ;;  %v1347_v33 = vmov 920167782  }
  0x2b   : > { %v218_v4 = vand.u32 2147483647, %v1454_v2  ;;  %v221_v5 = vand.u32 2139095040, %v1454_v2  ;;  %v581_v7 = vand.u32 2139095040, %v1456_v3  ;;  %v578_v9 = vand.u32 2147483647, %v1456_v3 }
  0x2c   : > { %v1348_v42 = vmov 1326507024   ;;  %s165_s23 = sadd.s32 1, %s1599_s22  ;;  %s163_s16 = sld [smem:[#allocation3 + %s1599_s22]] }
  0x2d   : > { %v225_v6 = vand.u32 8388607, %v218_v4  ;;  %v222_v8 = vshrl.u32 %v221_v5, 23  ;;  %v582_v10 = vshrl.u32 %v581_v7, 23  ;;  %v585_v15 = vand.u32 8388607, %v578_v9 }
  0x2e   : > { %s166_s24 = sld [smem:[#allocation3 + %s165_s23]]  ;;  %s1089_s4 = sshll.u32 %s1442_s12, 1 }
  0x2f   : > { %v1099_v11 = vadd.s32 4294967169, %v222_v8  ;;  %v226_v12 = vor.u32 8388608, %v225_v6  ;;  %v1114_v13 = vadd.s32 4294967169, %v582_v10  ;;  %v586_v20 = vor.u32 8388608, %v585_v15  ;;  %s1699_s6 = scalar_lea.vmem [#allocation7], %s1089_s4  ;;  %s1003_s18 = sshll.u32 %s999_s10, 4  ;;  %s1004_s18 = int_to_ptr.hbm [resolvable:$true] %s1003_s18 }
  0x30   : > { %s1001_s11 = sshll.u32 %s1699_s6, 4  ;;  %s988_s19 = scalar_lea.sflag [#allocation6], %s1442_s12  ;;  %s1002_s11 = int_to_ptr.vmem [resolvable:$true] %s1001_s11 }
  0x31   : > { %v228_v14 = vadd.s32 1, %v1099_v11  ;;  %v588_v16 = vadd.s32 1, %v1114_v13  ;;  %v1466_v18 = vshll.u32 %v226_v12, 8  ;;  %v1478_v40 = vshll.u32 %v586_v20, 8 }
  0x32   : > { %s1612_s28 = scvt.s32.f32 %s163_s16 }
  0x33   : > { %vm229_vm0 = vcmp.gt.s32.totalorder %v228_v14, 0  ;;  %vm589_vm1 = vcmp.gt.s32.totalorder %v588_v16, 0  ;;  %v267_v35 = vand.u32 65535, %v1466_v18  ;;  %v268_v36 = vshrl.u32 %v1466_v18, 16 }
  0x34   : > { %v230_v17 = vsel %vm229_vm0, %v228_v14, 0  ;;  %v590_v21 = vsel %vm589_vm1, %v588_v16, 0  ;;  %s1615_s29 = scvt.s32.f32 %s166_s24  ;;  %s170_s30 = smul.f32 %s1612_s28, %s1612_s28 }
  0x35   : > { %v232_v19 = vand.u32 31, %v230_v17  ;;  %v1468_v22 = vshrl.u32 %v230_v17, 5  ;;  %v1470_v23 = vand.u32 31, %v590_v21  ;;  %v1494_v53 = vshrl.u32 %v590_v21, 5  ;;  %s168_s5 = smul.f32 0.25, %s1612_s28  ;;  %s1274_s24 = scalar_lea.hbm %s1793_s2, 4 }
  0x36   : > { %s171_s3 = smul.f32 %s1615_s29, %s1615_s29 }
  0x37   : > { %v233_v24 = vsub.s32 32, %v232_v19  ;;  %v235_v26 = vshll.u32 %v1343_v25, %v232_v19  ;;  %v238_v28 = vshll.u32 %v1344_v27, %v232_v19  ;;  %v241_v30 = vshll.u32 %v1345_v29, %v232_v19  ;;  %s169_s7 = smul.f32 0.25, %s1615_s29 }
  0x38   : > { %v244_v32 = vshll.u32 %v1346_v31, %v232_v19  ;;  %v247_v34 = vshll.u32 %v1347_v33, %v232_v19  ;;  %vm250_vm2 = vcmp.lt.s32.totalorder %v1468_v22, 1  ;;  %vm253_vm3 = vcmp.lt.s32.totalorder %v1468_v22, 4 }
  0x39   : > { %v236_v37 = vshrl.u32 %v1344_v27, %v233_v24  ;;  %v239_v38 = vshrl.u32 %v1345_v29, %v233_v24  ;;  %v242_v39 = vshrl.u32 %v1346_v31, %v233_v24  ;;  %v245_v41 = vshrl.u32 %v1347_v33, %v233_v24 }
  0x3a   : > { %v248_v43 = vshrl.u32 %v1348_v42, %v233_v24  ;;  %v1485_v47 = vsub.s32 32, %v1470_v23  ;;  %v234_v48 = vshrl.u32 %v1343_v25, %v233_v24  ;;  %vm252_vm4 = vcmp.lt.s32.totalorder %v1468_v22, 3 }
  0x3b   : > { %v237_v44 = vor.u32 %v236_v37, %v235_v26  ;;  %v240_v45 = vor.u32 %v239_v38, %v238_v28  ;;  %v243_v46 = vor.u32 %v242_v39, %v241_v30  ;;  %v246_v49 = vor.u32 %v245_v41, %v244_v32 }
  0x3c   : > { %v249_v50 = vor.u32 %v248_v43, %v247_v34  ;;  %vm251_vm5 = vcmp.lt.s32.totalorder %v1468_v22, 2  ;;  %v595_v56 = vshll.u32 %v1343_v25, %v1470_v23  ;;  %v598_v57 = vshll.u32 %v1344_v27, %v1470_v23 }
  0x3d   : > { %v258_v51 = vsel %vm250_vm2, %v237_v44, %v240_v45  ;;  %v262_v52 = vsel %vm250_vm2, %v240_v45, %v243_v46  ;;  %v259_v54 = vsel %vm253_vm3, %v246_v49, 920167782  ;;  %v255_v58 = vsel %vm253_vm3, %v243_v46, 2102212464 }
  0x3e   : > { %v263_v55 = vsel %vm253_vm3, %v249_v50, 1326507024  ;;  %v260_v59 = vsel %vm252_vm4, %v243_v46, %v259_v54  ;;  %v596_v61 = vshrl.u32 %v1344_v27, %v1485_v47  ;;  %v254_v62 = vsel %vm250_vm2, %v234_v48, %v237_v44 }
  0x3f   : > { %v264_v60 = vsel %vm252_vm4, %v246_v49, %v263_v55  ;;  %v261_v63 = vsel %vm251_vm5, %v258_v51, %v260_v59  ;;  %v599_v1 = vshrl.u32 %v1345_v29, %v1485_v47  ;;  %v256_v10 = vsel %vm252_vm4, %v240_v45, %v255_v58 }
  0x40   : > { %v265_v0 = vsel %vm251_vm5, %v262_v52, %v264_v60  ;;  %v291_v7 = vand.u32 65535, %v261_v63  ;;  %v292_v8 = vshrl.u32 %v261_v63, 16  ;;  %v1519_v11 = vor.u32 %v596_v61, %v595_v56 }
  0x41   : > { %v269_v5 = vand.u32 65535, %v265_v0  ;;  %v270_v6 = vshrl.u32 %v265_v0, 16  ;;  %v1521_v12 = vor.u32 %v599_v1, %v598_v57  ;;  %v601_v13 = vshll.u32 %v1345_v29, %v1470_v23 }
  0x42   : > { %v602_v17 = vshrl.u32 %v1346_v31, %v1485_v47  ;;  %v293_v20 = vmul.u32 %v291_v7, %v267_v35  ;;  %v294_v21 = vmul.u32 %v292_v8, %v267_v35  ;;  %v295_v24 = vmul.u32 %v291_v7, %v268_v36 }
  0x43   : > { %v271_v14 = vmul.u32 %v269_v5, %v267_v35  ;;  %v272_v15 = vmul.u32 %v270_v6, %v267_v35  ;;  %v273_v16 = vmul.u32 %v269_v5, %v268_v36  ;;  %v274_v19 = vmul.u32 %v270_v6, %v268_v36 }
  0x44   : > { %v296_v30 = vmul.u32 %v292_v8, %v268_v36  ;;  %v297_v34 = vshll.u32 %v294_v21, 16  ;;  %v298_v37 = vshrl.u32 %v294_v21, 16  ;;  %v299_v38 = vshll.u32 %v295_v24, 16 }
  0x45   : > { %v275_v26 = vshll.u32 %v272_v15, 16  ;;  %v276_v27 = vshrl.u32 %v272_v15, 16  ;;  %v277_v28 = vshll.u32 %v273_v16, 16  ;;  %v278_v32 = vshrl.u32 %v273_v16, 16 }
  0x46   : > { %v300_v39 = vshrl.u32 %v295_v24, 16  ;;  %v604_v41 = vshll.u32 %v1346_v31, %v1470_v23  ;;  %v1349_v43 = vmov 0   ;;  %vm301_vm7 = vc.u32 %v293_v20, %v297_v34 }
  0x47   : > { %vm279_vm6 = vc.u32 %v271_v14, %v275_v26  ;;  %v281_v29 = vadd.s32 %v275_v26, %v271_v14  ;;  %v303_v35 = vadd.s32 %v297_v34, %v293_v20  ;;  %v605_v45 = vshrl.u32 %v1347_v33, %v1485_v47 }
  0x48   : > { %v280_v44 = vsel %vm279_vm6, 1, %v1349_v43  ;;  %v302_v36 = vsel %vm301_vm7, 1, %v1349_v43  ;;  %v607_v48 = vshll.u32 %v1347_v33, %v1470_v23  ;;  %v1535_v31 = vor.u32 %v602_v17, %v601_v13 }
  0x49   : > { %v282_v46 = vadd.s32 %v280_v44, %v274_v19  ;;  %vm283_vm8 = vc.u32 %v281_v29, %v277_v28  ;;  %v304_v50 = vadd.s32 %v302_v36, %v296_v30  ;;  %vm305_vm9 = vc.u32 %v303_v35, %v299_v38 }
  0x4a   : > { %v284_v49 = vsel %vm283_vm8, 1, %v1349_v43  ;;  %v306_v52 = vsel %vm305_vm9, 1, %v1349_v43  ;;  %v606_v54 = vor.u32 %v605_v45, %v604_v41  ;;  %v608_v55 = vshrl.u32 %v1348_v42, %v1485_v47 }
  0x4b   : > { %v286_v51 = vadd.s32 %v284_v49, %v282_v46  ;;  %v1540_v56 = vadd.s32 %v303_v35, %v299_v38  ;;  %v308_v57 = vadd.s32 %v306_v52, %v304_v50  ;;  %vm610_vm10 = vcmp.lt.s32.totalorder %v1494_v53, 1 }
  0x4c   : > { %vm612_vm11 = vcmp.lt.s32.totalorder %v1494_v53, 3  ;;  %v609_v33 = vor.u32 %v608_v55, %v607_v48  ;;  %vm611_vm12 = vcmp.lt.s32.totalorder %v1494_v53, 2  ;;  %vm613_vm13 = vcmp.lt.s32.totalorder %v1494_v53, 4 }
  0x4d   : > { %v287_v23 = vadd.s32 %v286_v51, %v276_v27  ;;  %v257_v58 = vsel %vm251_vm5, %v254_v62, %v256_v10  ;;  %v309_v59 = vadd.s32 %v308_v57, %v298_v37  ;;  %v618_v42 = vsel %vm610_vm10, %v1519_v11, %v1521_v12 }
  0x4e   : > { %v619_v60 = vsel %vm613_vm13, %v606_v54, 920167782  ;;  %v622_v22 = vsel %vm610_vm10, %v1521_v12, %v1535_v31  ;;  %v627_v62 = vand.u32 65535, %v1478_v40  ;;  %v623_v5 = vsel %vm613_vm13, %v609_v33, 1326507024 }
  0x4f   : > { %v1554_v61 = vadd.s32 %v287_v23, %v278_v32  ;;  %v620_v63 = vsel %vm612_vm11, %v1535_v31, %v619_v60  ;;  %v310_v0 = vadd.s32 %v309_v59, %v300_v39  ;;  %v628_v6 = vshrl.u32 %v1478_v40, 16 }
  0x50   : > { %v621_v1 = vsel %vm611_vm12, %v618_v42, %v620_v63  ;;  %v311_v7 = vmul.u32 %v1466_v18, %v257_v58  ;;  %v624_v8 = vsel %vm612_vm11, %v606_v54, %v623_v5  ;;  %v594_v55 = vshrl.u32 %v1343_v25, %v1485_v47 }
  0x51   : > { %vm313_vm14 = vc.u32 %v1554_v61, %v1540_v56  ;;  %v651_v10 = vand.u32 65535, %v621_v1  ;;  %v314_v13 = vadd.s32 1, %v310_v0  ;;  %v625_v14 = vsel %vm611_vm12, %v622_v22, %v624_v8 }
  0x52   : > { %v652_v15 = vshrl.u32 %v621_v1, 16  ;;  %v629_v16 = vand.u32 65535, %v625_v14  ;;  %v630_v17 = vshrl.u32 %v625_v14, 16  ;;  %v615_v33 = vsel %vm613_vm13, %v1535_v31, 2102212464 }
  0x53   : > { %v315_v19 = vsel %vm313_vm14, %v314_v13, %v310_v0  ;;  %v655_v21 = vmul.u32 %v651_v10, %v628_v6  ;;  %v653_v27 = vmul.u32 %v651_v10, %v627_v62  ;;  %v614_v25 = vsel %vm610_vm10, %v594_v55, %v1519_v11 }
  0x54   : > { %v654_v20 = vmul.u32 %v652_v15, %v627_v62  ;;  %v316_v24 = vadd.s32 %v315_v19, %v311_v7  ;;  %v631_v26 = vmul.u32 %v629_v16, %v627_v62  ;;  %v632_v18 = vmul.u32 %v630_v17, %v627_v62 }
  0x55   : > { %v633_v28 = vmul.u32 %v629_v16, %v628_v6  ;;  %v634_v34 = vmul.u32 %v630_v17, %v628_v6  ;;  %v656_v29 = vmul.u32 %v652_v15, %v628_v6  ;;  %v659_v39 = vshll.u32 %v655_v21, 16 }
  0x56   : > { %v657_v30 = vshll.u32 %v654_v20, 16  ;;  %v317_v32 = vadd.s32 536870912, %v316_v24  ;;  %v635_v37 = vshll.u32 %v632_v18, 16  ;;  %v636_v48 = vshrl.u32 %v632_v18, 16 }
  0x57   : > { %v637_v38 = vshll.u32 %v633_v28, 16  ;;  %v658_v51 = vshrl.u32 %v654_v20, 16  ;;  %v638_v58 = vshrl.u32 %v633_v28, 16  ;;  %v660_v59 = vshrl.u32 %v655_v21, 16 }
  0x58   : > { %v1576_v41 = vshrl.u32 %v317_v32, 30  ;;  %vm639_vm15 = vc.u32 %v631_v26, %v635_v37  ;;  %v641_v44 = vadd.s32 %v635_v37, %v631_v26  ;;  %vm661_vm0 = vc.u32 %v653_v27, %v657_v30  ;;  %v172_v32 = vld [vmem:[%s1446_s21] sm:$0x1]  ;;  %v1629_v37 = vld [vmem:[%s1446_s21 + $0x4] sm:$0x1] }
  0x59   : > { %v640_v35 = vsel %vm639_vm15, 1, %v1349_v43  ;;  %v662_v45 = vsel %vm661_vm0, 1, %v1349_v43  ;;  %v663_v46 = vadd.s32 %v657_v30, %v653_v27  ;;  %v616_v47 = vsel %vm612_vm11, %v1521_v12, %v615_v33 }
  0x5a   : > { %v319_v36 = vshll.u32 %v1576_v41, 30  ;;  %v642_v49 = vadd.s32 %v640_v35, %v634_v34  ;;  %vm643_vm1 = vc.u32 %v641_v44, %v637_v38  ;;  %v664_v52 = vadd.s32 %v662_v45, %v656_v29  ;;  %v1092_v34 = vld [vmem:[%s1446_s21 + $0x2] sm:$0x1] }
  0x5b   : > { %v644_v50 = vsel %vm643_vm1, 1, %v1349_v43  ;;  %vm665_vm2 = vc.u32 %v663_v46, %v659_v39  ;;  %v1596_v31 = vadd.s32 %v663_v46, %v659_v39  ;;  %v617_v6 = vsel %vm611_vm12, %v614_v25, %v616_v47  ;;  %v1093_v39 = vld [vmem:[%s1446_s21 + $0x3] sm:$0x1]  ;;  %v1645_v46 = vld [vmem:[%s1446_s21 + $0x5] sm:$0x1] }
  0x5c   : > { %v320_v54 = vsub.s32 %v316_v24, %v319_v36  ;;  %v646_v57 = vadd.s32 %v644_v50, %v642_v49  ;;  %v666_v23 = vsel %vm665_vm2, 1, %v1349_v43  ;;  %v312_v11 = vadd.s32 %v1540_v56, %v1554_v61 }
  0x5d   : > { %v668_v42 = vadd.s32 %v666_v23, %v664_v52  ;;  %v671_v14 = vmul.u32 %v1478_v40, %v617_v6  ;;  %vm220_vm6 = vcmp.lt.s32.totalorder %v1454_v2, 0  ;;  %vm1620_vm7 = vcmp.le.f32.partialorder %v218_v4, 0.7853982  ;;  %v1091_v4 = vld [vmem:[%s1446_s21 + $0x1] sm:$0x1] }
  0x5e   : > { %vm321_vm3 = vcmp.lt.s32.totalorder %v320_v54, 0  ;;  %v322_v60 = vsub.s32 0, %v320_v54  ;;  %v647_v63 = vadd.s32 %v646_v57, %v636_v48  ;;  %v197_v36 = vsub.f32 %v1092_v34, %v172_v32 }
  0x5f   : > { %v669_v22 = vadd.s32 %v668_v42, %v658_v51  ;;  %v199_v48 = vsub.f32 %v1629_v37, %v1092_v34  ;;  %v198_v50 = vsub.f32 %v1093_v39, %v1091_v4  ;;  %v1648_v51 = vstv %s170_s30 }
  0x60   : > { %v323_v62 = vsel %vm321_vm3, %v322_v60, %v320_v54  ;;  %v1594_v0 = vadd.s32 %v647_v63, %v638_v58  ;;  %v1650_v55 = vstv %s171_s3  ;;  %v200_v23 = vsub.f32 %v1645_v46, %v1093_v39 }
  0x61   : > { %v324_v43 = vclz %v323_v62  ;;  %v670_v1 = vadd.s32 %v669_v22, %v660_v59  ;;  %v202_v59 = vmul.f32 %v1648_v51, %v197_v36  ;;  %v208_v42 = vmul.f32 %v1648_v51, %v199_v48 }
  0x62   : > { %vm673_vm5 = vc.u32 %v1594_v0, %v1596_v31  ;;  %v672_v60 = vadd.s32 %v1596_v31, %v1594_v0  ;;  %v205_v63 = vmul.f32 %v1650_v55, %v198_v50  ;;  %v342_v47 = vsub.s32 4, %v1576_v41  ;;  %v1667_v0 = vld [vmem:[%s1446_s21 + $0xa] sm:$0x1] }
  0x63   : > { %v1100_v5 = vadd.s32 4294967294, %v324_v43  ;;  %v674_v7 = vadd.s32 1, %v670_v1  ;;  %v1660_v43 = vld [vmem:[%s1446_s21 + $0x8] sm:$0x1]  ;;  %vm580_vm10 = vcmp.lt.s32.totalorder %v1456_v3, 0  ;;  %vm361_vm1 = vweird.f32 %v1454_v2 }
  0x64   : > { %vm1716_vm11 = vcmp.le.f32.partialorder %v578_v9, 0.7853982 }
  0x65   : > { %vm1101_vm4 = vcmp.lt.s32.totalorder %v1100_v5, 0  ;;  %v675_v15 = vsel %vm673_vm5, %v674_v7, %v670_v1  ;;  %v210_v7 = vmul.f32 %v1650_v55, %v200_v23 }
  0x66   : > { %v327_v12 = vsel %vm1101_vm4, 0, %v1100_v5  ;;  %v676_v56 = vadd.s32 %v675_v15, %v671_v14  ;;  %v187_v14 = vadd.f32 %v1092_v34, %v172_v32  ;;  %v203_v15 = vmul.f32 %v202_v59, %v197_v36 }
  0x67   : > { %v328_v8 = vsub.s32 32, %v327_v12  ;;  %v329_v10 = vshll.u32 %v320_v54, %v327_v12  ;;  %v332_v13 = vsub.s32 4294967266, %v327_v12  ;;  %v1664_v12 = vld [vmem:[%s1446_s21 + $0x9] sm:$0x1] }
  0x68   : > { %v677_v21 = vadd.s32 536870912, %v676_v56 }
  0x69   : > { %v330_v53 = vshrl.u32 %v312_v11, %v328_v8  ;;  %v333_v16 = vadd.s32 127, %v332_v13  ;;  %v1671_v8 = vld [vmem:[%s1446_s21 + $0xb] sm:$0x1] }
  0x6a   : > { %v1610_v26 = vshrl.u32 %v677_v21, 30  ;;  %v1678_v21 = vld [vmem:[%s1446_s21 + $0xc] sm:$0x1] }
  0x6b   : > { %v331_v17 = vor.u32 %v330_v53, %v329_v10  ;;  %v334_v19 = vshll.u32 %v333_v16, 23  ;;  %v206_v16 = vmul.f32 %v205_v63, %v198_v50  ;;  %v1096_v63 = vld [vmem:[%s1446_s21 + $0x6] sm:$0x1] }
  0x6c   : > { %v679_v18 = vshll.u32 %v1610_v26, 30 }
  0x6d   : > { %v335_v61 = vor.u32 4788187, %v334_v19  ;;  %v338_v20 = vcvt.s32.f32 %v331_v17  ;;  %v209_v17 = vmul.f32 %v208_v42, %v199_v48  ;;  %v207_v36 = vadd.f32 %v206_v16, %v203_v15 }
  0x6e   : > { %v680_v30 = vsub.s32 %v676_v56, %v679_v18 }
  0x6f   : > { %v336_v24 = vand.u32 2147483647, %v335_v61  ;;  %v211_v61 = vmul.f32 %v210_v7, %v200_v23  ;;  %v213_v59 = vmul.f32 0.083333336, %v207_v36 }
  0x70   : > { %vm681_vm8 = vcmp.lt.s32.totalorder %v680_v30, 0  ;;  %v682_v29 = vsub.s32 0, %v680_v30 }
  0x71   : > { %v339_v40 = vmul.f32 %v338_v20, %v336_v24  ;;  %v343_v20 = vsel %vm220_vm6, %v342_v47, %v1576_v41  ;;  %v559_v24 = vsub.f32 %v1667_v0, %v1660_v43  ;;  %v192_v41 = vadd.f32 %v1093_v39, %v1091_v4 }
  0x72   : > { %v683_v45 = vsel %vm681_vm8, %v682_v29, %v680_v30  ;;  %v1688_v29 = vstv %s168_s5  ;;  %v345_v48 = vsel %vm1620_vm7, 0, %v343_v20  ;;  %v1111_v20 = vld [vmem:[%s1446_s21 + $0xe] sm:$0x1] }
  0x73   : > { %v340_v28 = vxor.u32 2147483648, %v339_v40  ;;  %v684_v49 = vclz %v683_v45  ;;  %v1691_v45 = vld [vmem:[%s1446_s21 + $0x12] sm:$0x1]  ;;  %v563_v39 = vmul.f32 %v559_v24, %v1648_v51  ;;  %v1710_v23 = vadd.f32 %v1645_v46, %v192_v41  ;;  %v1112_v41 = vld [vmem:[%s1446_s21 + $0xf] sm:$0x1] }
  0x74   : > { %986 = vst [vmem:[%s1699_s6 + $0x1] sm:$0x1] %v1691_v45 }
  0x75   : > { %v341_v38 = vsel %vm220_vm6, %v340_v28, %v339_v40  ;;  %v1115_v57 = vadd.s32 4294967294, %v684_v49  ;;  %v560_v40 = vsub.f32 %v1671_v8, %v1664_v12  ;;  %v561_v49 = vsub.f32 %v1678_v21, %v1667_v0 }
  0x76   : > { %v1640_v44 = vsel %vm1620_vm7, %v1454_v2, %v341_v38  ;;  %v188_v38 = vadd.f32 %v1629_v37, %v187_v14  ;;  %v212_v37 = vadd.f32 %v211_v61, %v209_v17 }
  0x77   : > { %v346_v35 = vmul.f32 %v1640_v44, %v1640_v44  ;;  %vm1116_vm9 = vcmp.lt.s32.totalorder %v1115_v57, 0  ;;  %v565_v27 = vmul.f32 %v560_v40, %v1650_v55  ;;  %v568_v42 = vmul.f32 %v561_v49, %v1648_v51 }
  0x78   : > { %v687_v25 = vsel %vm1116_vm9, 0, %v1115_v57  ;;  %v702_v57 = vsub.s32 4, %v1610_v26  ;;  %v189_v7 = vadd.f32 %v1096_v63, %v188_v38  ;;  %vm721_vm9 = vweird.f32 %v1456_v3 }
  0x79   : > { %v347_v52 = vmul.f32 -0.001358992, %v346_v35  ;;  %v354_v54 = vmul.f32 -0.00019511016, %v346_v35  ;;  %v688_v1 = vsub.s32 32, %v687_v25  ;;  %v689_v5 = vshll.u32 %v680_v30, %v687_v25 }
  0x7a   : > { %v692_v6 = vsub.s32 4294967266, %v687_v25  ;;  %v1685_v30 = vld [vmem:[%s1446_s21 + $0xd] sm:$0x1]  ;;  %v566_v25 = vmul.f32 %v565_v27, %v560_v40 }
  0x7b   : > { %v348_v33 = vadd.f32 0.041655596, %v347_v52  ;;  %v355_v58 = vadd.f32 0.008332121, %v354_v54  ;;  %v690_v10 = vshrl.u32 %v672_v60, %v688_v1  ;;  %v562_v4 = vsub.f32 %v1685_v30, %v1671_v8 }
  0x7c   : > { %v693_v13 = vadd.s32 127, %v692_v6  ;;  %v703_v6 = vsel %vm580_vm10, %v702_v57, %v1610_v26 }
  0x7d   : > { %v349_v22 = vmul.f32 %v348_v33, %v346_v35  ;;  %v356_v62 = vmul.f32 %v355_v58, %v346_v35  ;;  %v691_v19 = vor.u32 %v690_v10, %v689_v5  ;;  %v362_v33 = vand.u32 3, %v345_v48 }
  0x7e   : > { %v694_v56 = vshll.u32 %v693_v13, 23  ;;  %v516_v58 = vadd.s32 3, %v345_v48  ;;  %v570_v46 = vmul.f32 %v562_v4, %v1650_v55  ;;  %v705_v26 = vsel %vm1716_vm11, 0, %v703_v6 }
  0x7f   : > { %v357_v11 = vadd.f32 -0.16666654, %v356_v62  ;;  %v350_v31 = vadd.f32 -0.4999988, %v349_v22  ;;  %v698_v34 = vcvt.s32.f32 %v691_v19  ;;  %v214_v22 = vmul.f32 0.083333336, %v212_v37 }
  0x80   : > { %v695_v32 = vor.u32 4788187, %v694_v56  ;;  %v564_v62 = vmul.f32 %v563_v39, %v559_v24  ;;  %vm364_vm12 = vcmp.eq.s32.totalorder %v362_v33, 0  ;;  %vm367_vm13 = vcmp.eq.s32.totalorder %v362_v33, 2 }
  0x81   : > { %v358_v53 = vmul.f32 %v357_v11, %v346_v35  ;;  %v351_v18 = vmul.f32 %v350_v31, %v346_v35  ;;  %v517_v51 = vand.u32 3, %v516_v58  ;;  %v551_v11 = vadd.f32 %v1667_v0, %v1660_v43 }
  0x82   : > { %v696_v35 = vand.u32 2147483647, %v695_v32  ;;  %v569_v31 = vmul.f32 %v568_v42, %v561_v49  ;;  %vm363_vm14 = vcmp.lt.s32.totalorder %v362_v33, 2  ;;  %v567_v55 = vadd.f32 %v566_v25, %v564_v62 }
  0x83   : > { %v359_v28 = vadd.f32 1.0, %v358_v53  ;;  %v352_v50 = vadd.f32 1.0, %v351_v18  ;;  %v571_v13 = vmul.f32 %v570_v46, %v562_v4  ;;  %vm519_vm15 = vcmp.eq.s32.totalorder %v517_v51, 0  ;;  %v1097_v18 = vld [vmem:[%s1446_s21 + $0x7] sm:$0x1]  ;;  %s1268_s21 = sshra.s32 %s1004_s18, 4  ;;  %s1269_s21 = int_to_ptr.hbm [resolvable:$true] %s1268_s21 }
  0x84   : > { %v699_v54 = vmul.f32 %v698_v34, %v696_v35  ;;  %vm522_vm0 = vcmp.eq.s32.totalorder %v517_v51, 2  ;;  %v529_v17 = vsub.f32 %v213_v59, %v214_v22  ;;  %v555_v43 = vadd.f32 %v1671_v8, %v1664_v12  ;;  %s1270_s23 = scalar_lea.hbm %s1269_s21, 2  ;;  %p1275_p7 = scmp.lt.s32.totalorder %s1269_s21, %s1793_s2 }
  0x85   : > { %v360_v52 = vmul.f32 %v359_v28, %v1640_v44  ;;  %v368_v1 = vxor.u32 2147483648, %v352_v50  ;;  %v552_v0 = vadd.f32 %v1678_v21, %v551_v11  ;;  %vm518_vm2 = vcmp.lt.s32.totalorder %v517_v51, 2  ;;  %p1271_p4 = scmp.ne.s32.totalorder %s1269_s21, %s1270_s23  ;;  %p1276_p8 = scmp.lt.s32.totalorder %s1274_s24, %s1270_s23 }
  0x86   : > { %v700_v44 = vxor.u32 2147483648, %v699_v54  ;;  %v572_v24 = vadd.f32 %v571_v13, %v569_v31  ;;  %v876_v40 = vadd.s32 3, %v705_v26  ;;  %v527_v12 = vadd.f32 %v214_v22, %v213_v59 }
  0x87   : > { %v365_v47 = vxor.u32 2147483648, %v360_v52  ;;  %v369_v15 = vsel %vm367_vm13, %v368_v1, %v360_v52  ;;  %v524_v32 = vsel %vm522_vm0, %v368_v1, %v360_v52  ;;  %v530_v8 = vmul.f32 0.5, %v529_v17  ;;  %p1272_p5 = pnand %p1271_p4, %p1419_p9  ;;  %p1277_p10 = por %p1276_p8, %p1275_p7 }
  0x88   : > { %v701_v5 = vsel %vm580_vm10, %v700_v44, %v699_v54  ;;  %v556_v21 = vadd.f32 %v1685_v30, %v555_v43  ;;  %v573_v36 = vmul.f32 0.083333336, %v567_v55  ;;  %v553_v49 = vadd.f32 %v1111_v20, %v552_v0 }
  0x89   : > { %v704_v9 = vsel %vm1716_vm11, %v1456_v3, %v701_v5  ;;  %v366_v14 = vsel %vm364_vm12, %v352_v50, %v365_v47  ;;  %v521_v28 = vsel %vm519_vm15, %v352_v50, %v365_v47  ;;  %v574_v39 = vmul.f32 0.083333336, %v572_v24  ;;  %p1273_p6 = pneg %p1272_p5 }
  0x8a   : > { %v706_v10 = vmul.f32 %v704_v9, %v704_v9  ;;  %v370_v61 = vsel %vm363_vm14, %v366_v14, %v369_v15  ;;  %v525_v4 = vsel %vm518_vm2, %v521_v28, %v524_v32  ;;  %v722_v27 = vand.u32 3, %v705_v26 }
  0x8b   : > { %v371_v48 = vsel %vm361_vm1, nan, %v370_v61  ;;  %v877_v50 = vand.u32 3, %v876_v40  ;;  %v194_v52 = vadd.f32 %v1097_v18, %v1710_v23  ;;  %v195_v54 = vstv %s169_s7  ;;  %p1278_p13 = pnand %p1277_p10, %p1273_p6 }
  0x8c   : > { %v707_v53 = vmul.f32 -0.001358992, %v706_v10  ;;  %v714_v16 = vmul.f32 -0.00019511016, %v706_v10  ;;  %v191_v58 = vmul.f32 %v1688_v29, %v189_v7  ;;  %v528_v30 = vmul.f32 0.5, %v527_v12 }
  0x8d   : > { %v531_v59 = vmul.f32 %v530_v8, %v371_v48  ;;  %v557_v42 = vadd.f32 %v1112_v41, %v556_v21  ;;  %v526_v60 = vsel %vm361_vm1, nan, %v525_v4  ;;  %v554_v44 = vmul.f32 %v553_v49, %v1688_v29 }
  0x8e   : > { %v708_v19 = vadd.f32 0.041655596, %v707_v53  ;;  %v715_v56 = vadd.f32 0.008332121, %v714_v16  ;;  %vm723_vm3 = vcmp.lt.s32.totalorder %v722_v27, 2  ;;  %vm727_vm4 = vcmp.eq.s32.totalorder %v722_v27, 2 }
  0x8f   : > { %vm882_vm5 = vcmp.eq.s32.totalorder %v877_v50, 2  ;;  %v889_v62 = vsub.f32 %v573_v36, %v574_v39  ;;  %vm724_vm6 = vcmp.eq.s32.totalorder %v722_v27, 0  ;;  %v887_v46 = vadd.f32 %v574_v39, %v573_v36 }
  0x90   : > { %v709_v34 = vmul.f32 %v708_v19, %v706_v10  ;;  %v716_v38 = vmul.f32 %v715_v56, %v706_v10  ;;  %v532_v47 = vadd.f32 %v531_v59, %v528_v30  ;;  %v534_v1 = vmul.f32 %v530_v8, %v526_v60 }
  0x91   : > { %vm878_vm7 = vcmp.lt.s32.totalorder %v877_v50, 2  ;;  %vm879_vm8 = vcmp.eq.s32.totalorder %v877_v50, 0  ;;  %v533_v5 = vsub.f32 %v528_v30, %v531_v59  ;;  %v890_v29 = vmul.f32 0.5, %v889_v62 }
  0x92   : > { %v710_v35 = vadd.f32 -0.4999988, %v709_v34  ;;  %v717_v37 = vadd.f32 -0.16666654, %v716_v38  ;;  %v900_v7 = vsub.f32 %v191_v58, %v554_v44  ;;  %v196_v11 = vmul.f32 %v195_v54, %v194_v52 }
  0x93   : > { %v558_v55 = vmul.f32 %v557_v42, %v195_v54  ;;  %v888_v26 = vmul.f32 0.5, %v887_v46  ;;  %v919_v53 = vmul.f32 %v533_v5, %v532_v47  ;;  %v920_v16 = vmul.f32 %v534_v1, %v534_v1 }
  0x94   : > { %v711_v57 = vmul.f32 %v710_v35, %v706_v10  ;;  %v718_v33 = vmul.f32 %v717_v37, %v706_v10  ;;  %v914_v0 = vsub.f32 0.0, %v900_v7 }
  0x95   : > { %v901_v61 = vsub.f32 %v196_v11, %v558_v55  ;;  %v921_v20 = vsub.f32 %v919_v53, %v920_v16 }
  0x96   : > { %v712_v63 = vadd.f32 1.0, %v711_v57  ;;  %v719_v22 = vadd.f32 1.0, %v718_v33 }
  0x97   : > { %v922_v21 = vmax.f32 %v921_v20, 0.0 }
  0x98   : > { %v720_v23 = vmul.f32 %v719_v22, %v704_v9  ;;  %v728_v25 = vxor.u32 2147483648, %v712_v63 }
  0x9a   : > { %v725_v6 = vxor.u32 2147483648, %v720_v23  ;;  %v729_v2 = vsel %vm727_vm4, %v728_v25, %v720_v23  ;;  %v884_v51 = vsel %vm882_vm5, %v728_v25, %v720_v23 }
  0x9c   : > { %v726_v31 = vsel %vm724_vm6, %v712_v63, %v725_v6  ;;  %v881_v10 = vsel %vm879_vm8, %v712_v63, %v725_v6 }
  0x9d   : > { %v730_v9 = vsel %vm723_vm3, %v726_v31, %v729_v2  ;;  %v885_v13 = vsel %vm878_vm7, %v881_v10, %v884_v51 }
  0x9e   : > { %v731_v14 = vsel %vm721_vm9, nan, %v730_v9  ;;  %v886_v15 = vsel %vm721_vm9, nan, %v885_v13 }
  0x9f   : > { %v891_v17 = vmul.f32 %v890_v29, %v731_v14  ;;  %v894_v43 = vmul.f32 %v890_v29, %v886_v15 }
  0xa1   : > { %v892_v19 = vadd.f32 %v891_v17, %v888_v26  ;;  %v893_v56 = vsub.f32 %v888_v26, %v891_v17  ;;  %v899_v3 = vadd.f32 %v894_v43, %v534_v1  ;;  %v924_v24 = vmul.f32 %v894_v43, %v894_v43 }
  0xa3   : > { %v897_v40 = vadd.f32 %v892_v19, %v532_v47  ;;  %v898_v18 = vadd.f32 %v893_v56, %v533_v5  ;;  %v915_v28 = vmul.f32 %v914_v0, %v899_v3  ;;  %v923_v32 = vmul.f32 %v893_v56, %v892_v19 }
  0xa4   : > { %v903_v41 = vmul.f32 %v899_v3, %v899_v3 }
  0xa5   : > { %v907_v34 = vmul.f32 %v901_v61, %v897_v40  ;;  %v909_v38 = vmul.f32 %v900_v7, %v898_v18  ;;  %v916_v12 = vmul.f32 %v915_v28, %v901_v61  ;;  %v902_v8 = vmul.f32 %v898_v18, %v897_v40 }
  0xa6   : > { %v925_v36 = vsub.f32 %v923_v32, %v924_v24 }
  0xa7   : > { %v908_v48 = vmul.f32 %v907_v34, %v901_v61  ;;  %v910_v49 = vmul.f32 %v909_v38, %v900_v7  ;;  %v904_v4 = vsub.f32 %v902_v8, %v903_v41 }
  0xa8   : > { %v926_v35 = vmax.f32 %v925_v36, 0.0 }
  0xa9   : > { %v911_v37 = vadd.f32 %v910_v49, %v908_v48  ;;  %v905_v27 = vadd.f32 1e-07, %v904_v4 }
  0xaa   : > { %v927_v39 = vmul.f32 %v926_v35, %v922_v21 }
  0xac   : > { %1200 = vrsqrt.f32 %v927_v39  ;;  %vm935_vm10 = vcmp.eq.f32.partialorder %v927_v39, inf  ;;  %v938_v60 = vand.u32 2147483648, %v927_v39  ;;  %vm937_vm11 = vcmp.eq.f32.partialorder %v927_v39, 0.0 }
  0xad   : > { %1202 = vrcp.f32 %v905_v27 }
  0xb2   : > { %v1201_v50 = vpop.eup %1200 }
  0xb3   : > { %v929_v52 = vmul.f32 %v1201_v50, %v927_v39  ;;  %v1203_v33 = vpop.eup %1202 }
  0xb4   : > { %v912_v30 = vmul.f32 %v1203_v33, %v911_v37  ;;  %v917_v59 = vmul.f32 %v1203_v33, %v916_v12 }
  0xb5   : > { %v930_v54 = vmul.f32 %v1201_v50, %v929_v52 }
  0xb6   : > { %v913_v63 = vmul.f32 0.25, %v912_v30  ;;  %v918_v22 = vmul.f32 0.5, %v917_v59 }
  0xb7   : > { %v931_v57 = vmul.f32 0.5, %v930_v54 }
  0xb8   : > { %v961_v47 = vadd.f32 %v918_v22, %v913_v63 }
  0xb9   : > { %v932_v58 = vsub.f32 1.5, %v931_v57 }
  0xbb   : > { %v933_v42 = vmul.f32 %v1201_v50, %v932_v58 }
  0xbd   : > { %v934_v44 = vmul.f32 %v933_v42, %v927_v39 }
  0xbf   : > { %v936_v62 = vsel %vm935_vm10, %v927_v39, %v934_v44 }
  0xc0   : > { %v939_v23 = vsel %vm937_vm11, %v938_v60, %v936_v62 }
  0xc1   : > { %v940_v25 = vmul.f32 4.0, %v939_v23 }
  0xc3   : > { %v941_v46 = vadd.f32 1e-07, %v940_v25 }
  0xc5   : > { %1204 = vrcp.f32 %v941_v46  ;;  %v953_v6 = vand.u32 2147483648, %v941_v46  ;;  %vm947_vm12 = vweird.f32 %v941_v46  ;;  %v951_v51 = vand.u32 2147483647, %v941_v46 }
  0xc7   : > { %v954_v7 = vor.u32 1.1754944e-38, %v953_v6  ;;  %vm952_vm15 = vcmp.eq.f32.partialorder %v951_v51, 8.507059e+37 }
  0xcb   : > { %v1205_v1 = vpop.eup %1204 }
  0xcc   : > { %v943_v5 = vmul.f32 %v1205_v1, %v941_v46  ;;  %vm948_vm13 = vweird.f32 %v1205_v1 }
  0xcd   : > { %vm949_vm14 = vmor %vm947_vm12, %vm948_vm13 }
  0xce   : > { %v944_v2 = vsub.f32 1.0, %v943_v5 }
  0xd0   : > { %v945_v29 = vmul.f32 %v1205_v1, %v944_v2 }
  0xd2   : > { %v946_v11 = vadd.f32 %v1205_v1, %v945_v29 }
  0xd4   : > { %v950_v31 = vsel %vm949_vm14, %v1205_v1, %v946_v11 }
  0xd5   : > { %v955_v10 = vsel %vm952_vm15, %v954_v7, %v950_v31 }
  0xd6   : > { %v956_v55 = vmul.f32 %v955_v10, %v904_v4 }
  0xd8   : > { %v957_v9 = vadd.f32 1e-07, %v956_v55 }
  0xda   : > { %1206 = vlog2.f32 %v957_v9 }
  0xe0   : > { %v1207_v13 = vpop.eup %1206 }
  0xe1   : > { %v959_v26 = vmul.f32 0.6931472, %v1207_v13 }
  0xe3   : > { %v960_v14 = vmul.f32 0.5, %v959_v26 }
  0xe5   : > { %v962_v15 = vadd.f32 %v961_v47, %v960_v14 }
  0xe7   : > { %v963_v53 = vmax.f32 %v962_v15, 1e-07 }
  0xe9   : > { %v964_v16 = vmin.f32 %v963_v53, 100.0 }
  0xeb   : > { %v965_v17 = vsub.f32 0.0, %v964_v16 }
  0xed   : > { %v966_v43 = vmul.f32 1.442695, %v965_v17 }
  0xef   : > { %1208 = vpow2.f32 %v966_v43 }
  0xf5   : > { %v1209_v0 = vpop.eup %1208 }
  0xf6   : > { %v968_v19 = vsub.f32 1.0, %v1209_v0 }
  0xf8   : > { %v969_v56 = vadd.f32 1e-07, %v968_v19 }
  0xfa   : > { %1210 = vrsqrt.f32 %v969_v56  ;;  %vm977_vm0 = vcmp.eq.f32.partialorder %v969_v56, inf  ;;  %v980_v28 = vand.u32 2147483648, %v969_v56  ;;  %vm979_vm1 = vcmp.eq.f32.partialorder %v969_v56, 0.0 }
 0x100   : > { %v1211_v3 = vpop.eup %1210 }
 0x101   : > { %v971_v61 = vmul.f32 %v1211_v3, %v969_v56 }
 0x103   : > { %v972_v20 = vmul.f32 %v1211_v3, %v971_v61 }
 0x105   : > { %v973_v24 = vmul.f32 0.5, %v972_v20 }
 0x107   : > { %v974_v40 = vsub.f32 1.5, %v973_v24 }
 0x109   : > { %v975_v18 = vmul.f32 %v1211_v3, %v974_v40 }
 0x10b   : > { %v976_v32 = vmul.f32 %v975_v18, %v969_v56 }
 0x10d   : > { %v978_v34 = vsel %vm977_vm0, %v969_v56, %v976_v32 }
 0x10e   : > { %v981_v38 = vsel %vm979_vm1, %v980_v28, %v978_v34 }
 0x10f   : > { %v982_v12 = vmul.f32 %v1691_v45, %v981_v38 }
 0x111   : > { %984 = vst [vmem:[%s1699_s6] sm:$0x1] %v982_v12 }
 0x112   : > { %1281 = shalt.err (!%p1278_p13)
}
 0x113   : > { %1130 = dma.vmem_to_hbm [thread:$0]  (%p1419_p9), %s1002_s11, 32, %s1004_s18, %s988_s19  }
 0x114 PF: > { %s1015_s12 = sand.u32 1, %s1318_s13   ;;  %p1137_p0 = pnand %p1087_p12, %p1426_p11 }
 0x115   : > { %s1016_s30 = scalar_lea.sflag [#allocation6], %s1015_s12 }
 0x116   : > { %p1138_p1 = pneg %p1137_p0 }
 0x118   : > { %1313 = dma.done.wait (%p1138_p1), %s1016_s30, 32  }
 0x119   : > { %1315 = vsyncadd (%p1138_p1), %s1016_s30, 4294967264  ;;  %s26_s0 = sadd.s32 1, %s1338_s0   ;;  %s1802_s13 = smov %s1322_s14 }
 0x11a   : > { %p23_p2 = scmp.ge.s32.totalorder %s26_s0, 4   ;;  %s1803_s14 = smov %s1326_s15 }
 0x11b   : > { %s1804_s15 = smov %s1424_s26  ;;  %s1805_s16 = smov %s1334_s17 }
 0x11c   : > { %s1806_s17 = smov %s1808_s20  ;;  %25 = sbr.rel (!%p23_p2) target bundleno = 12 (0xc), region = 87 }
 0x121   :  { %1022 = vsyncpa [#allocation5], 1 }
 0x122   :  { %1024 = vsyncpa [#allocation5 + $0x1], 1 }
 0x123   :  { %1025 = vsyncpa [#allocation6], 1 }
 0x124   :  { %1027 = vsyncpa [#allocation6 + $0x1], 1 }

</bundles_post_ra>
